<compile_context>
chip_gen: v7x
topology: tpu7x:2x2x1
jax: 0.10.0
libtpu: 0.0.40
codegen_flags: <defaults>
</compile_context>

<pallas_src>
import functools

import jax
import jax.numpy as jnp
from jax.experimental import pallas as pl
from jax.experimental.pallas import tpu as pltpu

_NEG = -1e30      # sentinel for "no contribution yet"
_FAR = 1e9        # coordinate used to push invalid tail nodes out of range


def _context_kernel(hits_ref, ax_ref, ay_ref, nx_ref, ny_ref, nf_ref,
                    out_ref, acc_ref, *, dist_sq, n_nodes, nc, ta):
    """One (batch, actor-block, node-chunk) grid step.

    hits_ref : (B*nA*nK,) i32 SMEM  chunk-level "any in-range pair" bitmap
    ax/ay    : (tA, 1)              actor x / y centers for this actor block
    nx/ny    : (Nc, 1)              node  x / y centers for this node chunk
    nf       : (Nc, H)              node features for this node chunk
    out      : (tA, H)              output block (resident across node chunks)
    acc      : (tA, H) VMEM scratch running max accumulator
    """
    b = pl.program_id(0)
    ai = pl.program_id(1)
    nk = pl.program_id(2)

    @pl.when(nk == 0)
    def _init():
        acc_ref[...] = jnp.full(acc_ref.shape, _NEG, jnp.float32)

    flat = (b * pl.num_programs(1) + ai) * pl.num_programs(2) + nk

    # Sparsity skip: do nothing if no (actor, node) pair of this block/chunk is
    # within range (bitmap is computed conservatively in the wrapper).
    @pl.when(hits_ref[flat] > 0)
    def _process():
        # Tail-node handling: the last chunk may run past N; those rows hold
        # unspecified data, so push their centers far out of range.
        node_idx = jax.lax.broadcasted_iota(jnp.int32, (nc, 1), 0) + nk * nc
        ok = node_idx < n_nodes
        nx = jnp.where(ok, nx_ref[...], _FAR)        # [Nc, 1]
        ny = jnp.where(ok, ny_ref[...], _FAR)        # [Nc, 1]

        def _actor(a, carry):
            axv = ax_ref[pl.ds(a, 1), :]             # [1, 1]
            ayv = ay_ref[pl.ds(a, 1), :]             # [1, 1]
            dx = nx - axv                            # [Nc, 1]
            dy = ny - ayv
            in_range = (dx * dx + dy * dy) <= dist_sq            # [Nc, 1] bool
            # Masked max of the node features of this chunk for actor `a`
            # (select form -> exact feature maxima, no additive bias).
            row = jnp.max(jnp.where(in_range, nf_ref[...], _NEG),
                          axis=0, keepdims=True)                  # [1, H]
            acc_ref[pl.ds(a, 1), :] = jnp.maximum(acc_ref[pl.ds(a, 1), :], row)
            return carry

        jax.lax.fori_loop(0, ta, _actor, 0, unroll=(ta <= 16))

    @pl.when(nk == pl.num_programs(2) - 1)
    def _finalize():
        # scatter_max semantics: actors with no in-range node -> 0.
        acc = acc_ref[...]
        out_ref[...] = jnp.where(acc > 0.5 * _NEG, acc, 0.0)


def context_net_forward(actor_ctrs, node_ctrs, node_feats, dist_th):
    """ctx = ContextNet.forward(batch)  (MapNet outputs supplied as inputs)."""
    B, A, _ = actor_ctrs.shape
    _, N, H = node_feats.shape

    SUB = 8          # sublane granularity
    NC_CAP = 1024    # nodes per chunk (keeps vreg pressure / block DMA modest)
    TA_CAP = 256     # actors per block

    def _tile(dim, cap):
        if dim % SUB == 0:
            return min(dim, cap)
        if dim < SUB:
            return dim                       # block == full dim (always legal)
        return min(cap, (dim // SUB) * SUB)  # tail handled in-kernel / masked

    Nc = _tile(N, NC_CAP)
    tA = _tile(A, TA_CAP)
    nK = pl.cdiv(N, Nc)
    nA = pl.cdiv(A, tA)

    f32 = jnp.float32
    ax = actor_ctrs[..., 0:1].astype(f32)          # [B, A, 1]
    ay = actor_ctrs[..., 1:2].astype(f32)
    nx = node_ctrs[..., 0:1].astype(f32)           # [B, N, 1]
    ny = node_ctrs[..., 1:2].astype(f32)
    nf = node_feats.astype(f32)                    # [B, N, H]  (no padding copy)

    # Chunk-level "any in-range pair" bitmap, computed on the tiny coordinate
    # tensors (O(B*A*N), no H factor).  Threshold is slightly loosened so the
    # bitmap can never under-report a pair the kernel would keep.
    d2 = jnp.sum((actor_ctrs[:, :, None, :].astype(f32)
                  - node_ctrs[:, None, :, :].astype(f32)) ** 2, axis=-1)  # [B,A,N]
    inr = d2 <= (float(dist_th) ** 2) * (1.0 + 1e-6) + 1e-6
    inr = jnp.pad(inr, ((0, 0), (0, nA * tA - A), (0, nK * Nc - N)))
    hits = inr.reshape(B, nA, tA, nK, Nc).any(axis=(2, 4))
    hits = hits.astype(jnp.int32).reshape(-1)      # [B*nA*nK] -> SMEM prefetch

    # VMEM plan: double-buffered input blocks + out buffers + accumulator +
    # headroom for in-kernel temporaries.  (No A*Nc*H temp any more.)
    need = 4 * (2 * (Nc * H + 2 * Nc + 2 * tA)     # pipelined input blocks
                + 3 * tA * H                       # out buffers + acc scratch
                + 2 * Nc * H) + (1 << 20)          # temporaries + slack
    vmem_limit = int(min(max(need, 32 << 20), 48 << 20))

    kernel = functools.partial(_context_kernel, dist_sq=float(dist_th) ** 2,
                               n_nodes=N, nc=Nc, ta=tA)
    ctx = pl.pallas_call(
        kernel,
        out_shape=jax.ShapeDtypeStruct((B, A, H), jnp.float32),
        grid_spec=pltpu.PrefetchScalarGridSpec(
            num_scalar_prefetch=1,
            grid=(B, nA, nK),
            in_specs=[
                pl.BlockSpec((None, tA, 1), lambda b, ai, nk, hits: (b, ai, 0)),
                pl.BlockSpec((None, tA, 1), lambda b, ai, nk, hits: (b, ai, 0)),
                pl.BlockSpec((None, Nc, 1), lambda b, ai, nk, hits: (b, nk, 0)),
                pl.BlockSpec((None, Nc, 1), lambda b, ai, nk, hits: (b, nk, 0)),
                pl.BlockSpec((None, Nc, H), lambda b, ai, nk, hits: (b, nk, 0)),
            ],
            out_specs=pl.BlockSpec((None, tA, H),
                                   lambda b, ai, nk, hits: (b, ai, 0)),
            scratch_shapes=[pltpu.VMEM((tA, H), jnp.float32)],
        ),
        compiler_params=pltpu.CompilerParams(
            dimension_semantics=("parallel", "parallel", "arbitrary"),
            vmem_limit_bytes=vmem_limit),
    )(hits, ax, ay, nx, ny, nf)

    # Flatten batch-major (matches hi_count ordering); contiguous reshape only.
    return ctx.reshape(B * A, H)


def _reference(actor_ctrs, node_ctrs, node_feats, dist_th):
    """Pure-JAX mirror of the PyTorch forward (per-batch python loop)."""
    B = actor_ctrs.shape[0]
    outs = []
    for b in range(B):
        d = jnp.sqrt(
            jnp.sum((actor_ctrs[b][:, None, :] - node_ctrs[b][None, :, :]) ** 2,
                    axis=-1))
        m = d <= dist_th
        feats = jnp.where(m[:, :, None], node_feats[b][None, :, :], -jnp.inf)
        ctx = jnp.max(feats, axis=1)
        ctx = jnp.where(jnp.any(m, axis=1, keepdims=True), ctx, 0.0)
        outs.append(ctx)
    return jnp.concatenate(outs, axis=0)


if __name__ == "__main__":
    config = {"map2actor_dist": 6.0, "n_map": 32}

    B, A, N, H = 2, 8, 16, config["n_map"]

    key = jax.random.PRNGKey(0)
    k_ac, k_nc, k_nf = jax.random.split(key, 3)

    # Deterministic synthetic "MapNet" outputs and actor centers.
    actor_ctrs = jax.random.uniform(k_ac, (B, A, 2), jnp.float32, -10.0, 10.0)
    node_ctrs = jax.random.uniform(k_nc, (B, N, 2), jnp.float32, -10.0, 10.0)
    node_feats = jax.random.normal(k_nf, (B, N, H), jnp.float32)

    ctx = context_net_forward(actor_ctrs, node_ctrs, node_feats,
                              config["map2actor_dist"])
    ctx = jax.block_until_ready(ctx)

    ref = _reference(actor_ctrs, node_ctrs, node_feats, config["map2actor_dist"])
    assert ctx.shape == (B * A, H), ctx.shape
    assert jnp.allclose(ctx, ref, atol=1e-5, rtol=1e-5), "mismatch vs reference"

    print("KERNEL_OK")
</pallas_src>

<mosaic_0001>
module attributes {stable_mosaic.version = 11 : i64} {
  func.func @_context_kernel(%arg0: i32, %arg1: i32, %arg2: i32, %arg3: memref<2xi32, #tpu.memory_space<smem>>, %arg4: memref<1x8x1xf32, #tpu.memory_space<vmem>>, %arg5: memref<1x8x1xf32, #tpu.memory_space<vmem>>, %arg6: memref<1x16x1xf32, #tpu.memory_space<vmem>>, %arg7: memref<1x16x1xf32, #tpu.memory_space<vmem>>, %arg8: memref<1x16x32xf32, #tpu.memory_space<vmem>>, %arg9: memref<1x8x32xf32, #tpu.memory_space<vmem>>, %arg10: memref<8x32xf32, #tpu.memory_space<vmem>>) attributes {dimension_semantics = [#tpu.dimension_semantics<parallel>, #tpu.dimension_semantics<parallel>, #tpu.dimension_semantics<arbitrary>], iteration_bounds = array<i64: 2, 1, 1>, scalar_prefetch = 1 : i64, scratch_operands = 1 : i64, tpu.core_type = #tpu.core_type<tc>, window_params = [{transform_indices = @transform_0, window_bounds = array<i64: 1, 8, 1>}, {transform_indices = @transform_1, window_bounds = array<i64: 1, 8, 1>}, {transform_indices = @transform_2, window_bounds = array<i64: 1, 16, 1>}, {transform_indices = @transform_3, window_bounds = array<i64: 1, 16, 1>}, {transform_indices = @transform_4, window_bounds = array<i64: 1, 16, 32>}, {transform_indices = @transform_5, window_bounds = array<i64: 1, 8, 32>}]} {
    %c0_i32 = arith.constant 0 : i32
    %0 = arith.cmpi eq, %arg2, %c0_i32 : i32
    %1 = arith.extui %0 : i1 to i32
    %c0_i32_0 = arith.constant 0 : i32
    %2 = arith.cmpi ne, %1, %c0_i32_0 : i32
    scf.if %2 {
      %cst = arith.constant -1.000000e+30 : f32
      %15 = vector.broadcast %cst : f32 to vector<8x32xf32>
      %c0 = arith.constant 0 : index
      %c0_6 = arith.constant 0 : index
      %16 = vector.load %arg10[%c0, %c0_6] : memref<8x32xf32, #tpu.memory_space<vmem>>, vector<8x32xf32>
      tpu.vector_store %arg10[%c0, %c0_6], %15 {strides = array<i32>} : memref<8x32xf32, #tpu.memory_space<vmem>>, vector<8x32xf32>,
    } else {
    }
    %c1_i32 = arith.constant 1 : i32
    %3 = arith.muli %arg0, %c1_i32 : i32
    %4 = arith.addi %3, %arg1 : i32
    %c1_i32_1 = arith.constant 1 : i32
    %5 = arith.muli %4, %c1_i32_1 : i32
    %6 = arith.addi %5, %arg2 : i32
    %7 = arith.index_cast %6 : i32 to index
    %8 = memref.load %arg3[%7] : memref<2xi32, #tpu.memory_space<smem>>
    %c0_i32_2 = arith.constant 0 : i32
    %9 = arith.cmpi sgt, %8, %c0_i32_2 : i32
    %10 = arith.extui %9 : i1 to i32
    %c0_i32_3 = arith.constant 0 : i32
    %11 = arith.cmpi ne, %10, %c0_i32_3 : i32
    scf.if %11 {
      %15 = tpu.iota {dimensions = array<i32: 0>} : vector<16x1xi32>
      %c16_i32 = arith.constant 16 : i32
      %16 = arith.muli %arg2, %c16_i32 : i32
      %17 = vector.broadcast %16 : i32 to vector<16x1xi32>
      %18 = arith.addi %15, %17 : vector<16x1xi32>
      %c16_i32_6 = arith.constant 16 : i32
      %19 = vector.broadcast %c16_i32_6 : i32 to vector<16x1xi32>
      %20 = arith.cmpi slt, %18, %19 : vector<16x1xi32>
      %c0 = arith.constant 0 : index
      %c0_7 = arith.constant 0 : index
      %c0_8 = arith.constant 0 : index
      %21 = vector.load %arg6[%c0, %c0_7, %c0_8] : memref<1x16x1xf32, #tpu.memory_space<vmem>>, vector<1x16x1xf32>
      %22 = vector.shape_cast %21 : vector<1x16x1xf32> to vector<16x1xf32>
      %cst = arith.constant 1.000000e+09 : f32
      %23 = vector.broadcast %cst : f32 to vector<16x1xf32>
      %24 = arith.select %20, %22, %23 : vector<16x1xi1>, vector<16x1xf32>
      %c0_9 = arith.constant 0 : index
      %c0_10 = arith.constant 0 : index
      %c0_11 = arith.constant 0 : index
      %25 = vector.load %arg7[%c0_9, %c0_10, %c0_11] : memref<1x16x1xf32, #tpu.memory_space<vmem>>, vector<1x16x1xf32>
      %26 = vector.shape_cast %25 : vector<1x16x1xf32> to vector<16x1xf32>
      %cst_12 = arith.constant 1.000000e+09 : f32
      %27 = vector.broadcast %cst_12 : f32 to vector<16x1xf32>
      %28 = arith.select %20, %26, %27 : vector<16x1xi1>, vector<16x1xf32>
      %c0_i32_13 = arith.constant 0 : i32
      %c0_14 = arith.constant 0 : index
      %29 = arith.index_cast %c0_i32_13 : i32 to index
      %c0_15 = arith.constant 0 : index
      %30 = vector.load %arg4[%c0_14, %29, %c0_15] : memref<1x8x1xf32, #tpu.memory_space<vmem>>, vector<1x1x1xf32>
      %31 = vector.shape_cast %30 : vector<1x1x1xf32> to vector<1x1xf32>
      %c0_16 = arith.constant 0 : index
      %32 = arith.index_cast %c0_i32_13 : i32 to index
      %c0_17 = arith.constant 0 : index
      %33 = vector.load %arg5[%c0_16, %32, %c0_17] : memref<1x8x1xf32, #tpu.memory_space<vmem>>, vector<1x1x1xf32>
      %34 = vector.shape_cast %33 : vector<1x1x1xf32> to vector<1x1xf32>
      %35 = vector.broadcast %31 : vector<1x1xf32> to vector<16x1xf32>
      %36 = arith.subf %24, %35 : vector<16x1xf32>
      %37 = vector.broadcast %34 : vector<1x1xf32> to vector<16x1xf32>
      %38 = arith.subf %28, %37 : vector<16x1xf32>
      %39 = arith.mulf %36, %36 : vector<16x1xf32>
      %40 = arith.mulf %38, %38 : vector<16x1xf32>
      %41 = arith.addf %39, %40 : vector<16x1xf32>
      %cst_18 = arith.constant 3.600000e+01 : f32
      %42 = vector.broadcast %cst_18 : f32 to vector<16x1xf32>
      %43 = arith.cmpf ole, %41, %42 : vector<16x1xf32>
      %c0_19 = arith.constant 0 : index
      %c0_20 = arith.constant 0 : index
      %c0_21 = arith.constant 0 : index
      %44 = vector.load %arg8[%c0_19, %c0_20, %c0_21] : memref<1x16x32xf32, #tpu.memory_space<vmem>>, vector<1x16x32xf32>
      %45 = vector.shape_cast %44 : vector<1x16x32xf32> to vector<16x32xf32>
      %cst_22 = arith.constant -1.000000e+30 : f32
      %46 = vector.shape_cast %43 : vector<16x1xi1> to vector<16x1xi1>
      %47 = vector.broadcast %46 : vector<16x1xi1> to vector<16x32xi1>
      %48 = vector.broadcast %cst_22 : f32 to vector<16x32xf32>
      %49 = arith.select %47, %45, %48 : vector<16x32xi1>, vector<16x32xf32>
      %cst_23 = arith.constant dense<0xFF800000> : vector<32xf32>
      %50 = vector.multi_reduction <maximumf>, %49, %cst_23 [0] : vector<16x32xf32> to vector<32xf32>
      %51 = vector.shape_cast %50 : vector<32xf32> to vector<1x32xf32>
      %52 = arith.index_cast %c0_i32_13 : i32 to index
      %c0_24 = arith.constant 0 : index
      %53 = vector.load %arg10[%52, %c0_24] : memref<8x32xf32, #tpu.memory_space<vmem>>, vector<1x32xf32>
      %54 = arith.maximumf %53, %51 : vector<1x32xf32>
      %55 = arith.index_cast %c0_i32_13 : i32 to index
      %c0_25 = arith.constant 0 : index
      %56 = vector.load %arg10[%55, %c0_25] : memref<8x32xf32, #tpu.memory_space<vmem>>, vector<1x32xf32>
      tpu.vector_store %arg10[%55, %c0_25], %54 {strides = array<i32>} : memref<8x32xf32, #tpu.memory_space<vmem>>, vector<1x32xf32>,
      %c1_i32_26 = arith.constant 1 : i32
      %c0_27 = arith.constant 0 : index
      %57 = arith.index_cast %c1_i32_26 : i32 to index
      %c0_28 = arith.constant 0 : index
      %58 = vector.load %arg4[%c0_27, %57, %c0_28] : memref<1x8x1xf32, #tpu.memory_space<vmem>>, vector<1x1x1xf32>
      %59 = vector.shape_cast %58 : vector<1x1x1xf32> to vector<1x1xf32>
      %c0_29 = arith.constant 0 : index
      %60 = arith.index_cast %c1_i32_26 : i32 to index
      %c0_30 = arith.constant 0 : index
      %61 = vector.load %arg5[%c0_29, %60, %c0_30] : memref<1x8x1xf32, #tpu.memory_space<vmem>>, vector<1x1x1xf32>
      %62 = vector.shape_cast %61 : vector<1x1x1xf32> to vector<1x1xf32>
      %63 = vector.broadcast %59 : vector<1x1xf32> to vector<16x1xf32>
      %64 = arith.subf %24, %63 : vector<16x1xf32>
      %65 = vector.broadcast %62 : vector<1x1xf32> to vector<16x1xf32>
      %66 = arith.subf %28, %65 : vector<16x1xf32>
      %67 = arith.mulf %64, %64 : vector<16x1xf32>
      %68 = arith.mulf %66, %66 : vector<16x1xf32>
      %69 = arith.addf %67, %68 : vector<16x1xf32>
      %cst_31 = arith.constant 3.600000e+01 : f32
      %70 = vector.broadcast %cst_31 : f32 to vector<16x1xf32>
      %71 = arith.cmpf ole, %69, %70 : vector<16x1xf32>
      %c0_32 = arith.constant 0 : index
      %c0_33 = arith.constant 0 : index
      %c0_34 = arith.constant 0 : index
      %72 = vector.load %arg8[%c0_32, %c0_33, %c0_34] : memref<1x16x32xf32, #tpu.memory_space<vmem>>, vector<1x16x32xf32>
      %73 = vector.shape_cast %72 : vector<1x16x32xf32> to vector<16x32xf32>
      %cst_35 = arith.constant -1.000000e+30 : f32
      %74 = vector.shape_cast %71 : vector<16x1xi1> to vector<16x1xi1>
      %75 = vector.broadcast %74 : vector<16x1xi1> to vector<16x32xi1>
      %76 = vector.broadcast %cst_35 : f32 to vector<16x32xf32>
      %77 = arith.select %75, %73, %76 : vector<16x32xi1>, vector<16x32xf32>
      %cst_36 = arith.constant dense<0xFF800000> : vector<32xf32>
      %78 = vector.multi_reduction <maximumf>, %77, %cst_36 [0] : vector<16x32xf32> to vector<32xf32>
      %79 = vector.shape_cast %78 : vector<32xf32> to vector<1x32xf32>
      %80 = arith.index_cast %c1_i32_26 : i32 to index
      %c0_37 = arith.constant 0 : index
      %81 = vector.load %arg10[%80, %c0_37] : memref<8x32xf32, #tpu.memory_space<vmem>>, vector<1x32xf32>
      %82 = arith.maximumf %81, %79 : vector<1x32xf32>
      %83 = arith.index_cast %c1_i32_26 : i32 to index
      %c0_38 = arith.constant 0 : index
      %84 = vector.load %arg10[%83, %c0_38] : memref<8x32xf32, #tpu.memory_space<vmem>>, vector<1x32xf32>
      tpu.vector_store %arg10[%83, %c0_38], %82 {strides = array<i32>} : memref<8x32xf32, #tpu.memory_space<vmem>>, vector<1x32xf32>,
      %c2_i32 = arith.constant 2 : i32
      %c0_39 = arith.constant 0 : index
      %85 = arith.index_cast %c2_i32 : i32 to index
      %c0_40 = arith.constant 0 : index
      %86 = vector.load %arg4[%c0_39, %85, %c0_40] : memref<1x8x1xf32, #tpu.memory_space<vmem>>, vector<1x1x1xf32>
      %87 = vector.shape_cast %86 : vector<1x1x1xf32> to vector<1x1xf32>
      %c0_41 = arith.constant 0 : index
      %88 = arith.index_cast %c2_i32 : i32 to index
      %c0_42 = arith.constant 0 : index
      %89 = vector.load %arg5[%c0_41, %88, %c0_42] : memref<1x8x1xf32, #tpu.memory_space<vmem>>, vector<1x1x1xf32>
      %90 = vector.shape_cast %89 : vector<1x1x1xf32> to vector<1x1xf32>
      %91 = vector.broadcast %87 : vector<1x1xf32> to vector<16x1xf32>
      %92 = arith.subf %24, %91 : vector<16x1xf32>
      %93 = vector.broadcast %90 : vector<1x1xf32> to vector<16x1xf32>
      %94 = arith.subf %28, %93 : vector<16x1xf32>
      %95 = arith.mulf %92, %92 : vector<16x1xf32>
      %96 = arith.mulf %94, %94 : vector<16x1xf32>
      %97 = arith.addf %95, %96 : vector<16x1xf32>
      %cst_43 = arith.constant 3.600000e+01 : f32
      %98 = vector.broadcast %cst_43 : f32 to vector<16x1xf32>
      %99 = arith.cmpf ole, %97, %98 : vector<16x1xf32>
      %c0_44 = arith.constant 0 : index
      %c0_45 = arith.constant 0 : index
      %c0_46 = arith.constant 0 : index
      %100 = vector.load %arg8[%c0_44, %c0_45, %c0_46] : memref<1x16x32xf32, #tpu.memory_space<vmem>>, vector<1x16x32xf32>
      %101 = vector.shape_cast %100 : vector<1x16x32xf32> to vector<16x32xf32>
      %cst_47 = arith.constant -1.000000e+30 : f32
      %102 = vector.shape_cast %99 : vector<16x1xi1> to vector<16x1xi1>
      %103 = vector.broadcast %102 : vector<16x1xi1> to vector<16x32xi1>
      %104 = vector.broadcast %cst_47 : f32 to vector<16x32xf32>
      %105 = arith.select %103, %101, %104 : vector<16x32xi1>, vector<16x32xf32>
      %cst_48 = arith.constant dense<0xFF800000> : vector<32xf32>
      %106 = vector.multi_reduction <maximumf>, %105, %cst_48 [0] : vector<16x32xf32> to vector<32xf32>
      %107 = vector.shape_cast %106 : vector<32xf32> to vector<1x32xf32>
      %108 = arith.index_cast %c2_i32 : i32 to index
      %c0_49 = arith.constant 0 : index
      %109 = vector.load %arg10[%108, %c0_49] : memref<8x32xf32, #tpu.memory_space<vmem>>, vector<1x32xf32>
      %110 = arith.maximumf %109, %107 : vector<1x32xf32>
      %111 = arith.index_cast %c2_i32 : i32 to index
      %c0_50 = arith.constant 0 : index
      %112 = vector.load %arg10[%111, %c0_50] : memref<8x32xf32, #tpu.memory_space<vmem>>, vector<1x32xf32>
      tpu.vector_store %arg10[%111, %c0_50], %110 {strides = array<i32>} : memref<8x32xf32, #tpu.memory_space<vmem>>, vector<1x32xf32>,
      %c3_i32 = arith.constant 3 : i32
      %c0_51 = arith.constant 0 : index
      %113 = arith.index_cast %c3_i32 : i32 to index
      %c0_52 = arith.constant 0 : index
      %114 = vector.load %arg4[%c0_51, %113, %c0_52] : memref<1x8x1xf32, #tpu.memory_space<vmem>>, vector<1x1x1xf32>
      %115 = vector.shape_cast %114 : vector<1x1x1xf32> to vector<1x1xf32>
      %c0_53 = arith.constant 0 : index
      %116 = arith.index_cast %c3_i32 : i32 to index
      %c0_54 = arith.constant 0 : index
      %117 = vector.load %arg5[%c0_53, %116, %c0_54] : memref<1x8x1xf32, #tpu.memory_space<vmem>>, vector<1x1x1xf32>
      %118 = vector.shape_cast %117 : vector<1x1x1xf32> to vector<1x1xf32>
      %119 = vector.broadcast %115 : vector<1x1xf32> to vector<16x1xf32>
      %120 = arith.subf %24, %119 : vector<16x1xf32>
      %121 = vector.broadcast %118 : vector<1x1xf32> to vector<16x1xf32>
      %122 = arith.subf %28, %121 : vector<16x1xf32>
      %123 = arith.mulf %120, %120 : vector<16x1xf32>
      %124 = arith.mulf %122, %122 : vector<16x1xf32>
      %125 = arith.addf %123, %124 : vector<16x1xf32>
      %cst_55 = arith.constant 3.600000e+01 : f32
      %126 = vector.broadcast %cst_55 : f32 to vector<16x1xf32>
      %127 = arith.cmpf ole, %125, %126 : vector<16x1xf32>
      %c0_56 = arith.constant 0 : index
      %c0_57 = arith.constant 0 : index
      %c0_58 = arith.constant 0 : index
      %128 = vector.load %arg8[%c0_56, %c0_57, %c0_58] : memref<1x16x32xf32, #tpu.memory_space<vmem>>, vector<1x16x32xf32>
      %129 = vector.shape_cast %128 : vector<1x16x32xf32> to vector<16x32xf32>
      %cst_59 = arith.constant -1.000000e+30 : f32
      %130 = vector.shape_cast %127 : vector<16x1xi1> to vector<16x1xi1>
      %131 = vector.broadcast %130 : vector<16x1xi1> to vector<16x32xi1>
      %132 = vector.broadcast %cst_59 : f32 to vector<16x32xf32>
      %133 = arith.select %131, %129, %132 : vector<16x32xi1>, vector<16x32xf32>
      %cst_60 = arith.constant dense<0xFF800000> : vector<32xf32>
      %134 = vector.multi_reduction <maximumf>, %133, %cst_60 [0] : vector<16x32xf32> to vector<32xf32>
      %135 = vector.shape_cast %134 : vector<32xf32> to vector<1x32xf32>
      %136 = arith.index_cast %c3_i32 : i32 to index
      %c0_61 = arith.constant 0 : index
      %137 = vector.load %arg10[%136, %c0_61] : memref<8x32xf32, #tpu.memory_space<vmem>>, vector<1x32xf32>
      %138 = arith.maximumf %137, %135 : vector<1x32xf32>
      %139 = arith.index_cast %c3_i32 : i32 to index
      %c0_62 = arith.constant 0 : index
      %140 = vector.load %arg10[%139, %c0_62] : memref<8x32xf32, #tpu.memory_space<vmem>>, vector<1x32xf32>
      tpu.vector_store %arg10[%139, %c0_62], %138 {strides = array<i32>} : memref<8x32xf32, #tpu.memory_space<vmem>>, vector<1x32xf32>,
      %c4_i32 = arith.constant 4 : i32
      %c0_63 = arith.constant 0 : index
      %141 = arith.index_cast %c4_i32 : i32 to index
      %c0_64 = arith.constant 0 : index
      %142 = vector.load %arg4[%c0_63, %141, %c0_64] : memref<1x8x1xf32, #tpu.memory_space<vmem>>, vector<1x1x1xf32>
      %143 = vector.shape_cast %142 : vector<1x1x1xf32> to vector<1x1xf32>
      %c0_65 = arith.constant 0 : index
      %144 = arith.index_cast %c4_i32 : i32 to index
      %c0_66 = arith.constant 0 : index
      %145 = vector.load %arg5[%c0_65, %144, %c0_66] : memref<1x8x1xf32, #tpu.memory_space<vmem>>, vector<1x1x1xf32>
      %146 = vector.shape_cast %145 : vector<1x1x1xf32> to vector<1x1xf32>
      %147 = vector.broadcast %143 : vector<1x1xf32> to vector<16x1xf32>
      %148 = arith.subf %24, %147 : vector<16x1xf32>
      %149 = vector.broadcast %146 : vector<1x1xf32> to vector<16x1xf32>
      %150 = arith.subf %28, %149 : vector<16x1xf32>
      %151 = arith.mulf %148, %148 : vector<16x1xf32>
      %152 = arith.mulf %150, %150 : vector<16x1xf32>
      %153 = arith.addf %151, %152 : vector<16x1xf32>
      %cst_67 = arith.constant 3.600000e+01 : f32
      %154 = vector.broadcast %cst_67 : f32 to vector<16x1xf32>
      %155 = arith.cmpf ole, %153, %154 : vector<16x1xf32>
      %c0_68 = arith.constant 0 : index
      %c0_69 = arith.constant 0 : index
      %c0_70 = arith.constant 0 : index
      %156 = vector.load %arg8[%c0_68, %c0_69, %c0_70] : memref<1x16x32xf32, #tpu.memory_space<vmem>>, vector<1x16x32xf32>
      %157 = vector.shape_cast %156 : vector<1x16x32xf32> to vector<16x32xf32>
      %cst_71 = arith.constant -1.000000e+30 : f32
      %158 = vector.shape_cast %155 : vector<16x1xi1> to vector<16x1xi1>
      %159 = vector.broadcast %158 : vector<16x1xi1> to vector<16x32xi1>
      %160 = vector.broadcast %cst_71 : f32 to vector<16x32xf32>
      %161 = arith.select %159, %157, %160 : vector<16x32xi1>, vector<16x32xf32>
      %cst_72 = arith.constant dense<0xFF800000> : vector<32xf32>
      %162 = vector.multi_reduction <maximumf>, %161, %cst_72 [0] : vector<16x32xf32> to vector<32xf32>
      %163 = vector.shape_cast %162 : vector<32xf32> to vector<1x32xf32>
      %164 = arith.index_cast %c4_i32 : i32 to index
      %c0_73 = arith.constant 0 : index
      %165 = vector.load %arg10[%164, %c0_73] : memref<8x32xf32, #tpu.memory_space<vmem>>, vector<1x32xf32>
      %166 = arith.maximumf %165, %163 : vector<1x32xf32>
      %167 = arith.index_cast %c4_i32 : i32 to index
      %c0_74 = arith.constant 0 : index
      %168 = vector.load %arg10[%167, %c0_74] : memref<8x32xf32, #tpu.memory_space<vmem>>, vector<1x32xf32>
      tpu.vector_store %arg10[%167, %c0_74], %166 {strides = array<i32>} : memref<8x32xf32, #tpu.memory_space<vmem>>, vector<1x32xf32>,
      %c5_i32 = arith.constant 5 : i32
      %c0_75 = arith.constant 0 : index
      %169 = arith.index_cast %c5_i32 : i32 to index
      %c0_76 = arith.constant 0 : index
      %170 = vector.load %arg4[%c0_75, %169, %c0_76] : memref<1x8x1xf32, #tpu.memory_space<vmem>>, vector<1x1x1xf32>
      %171 = vector.shape_cast %170 : vector<1x1x1xf32> to vector<1x1xf32>
      %c0_77 = arith.constant 0 : index
      %172 = arith.index_cast %c5_i32 : i32 to index
      %c0_78 = arith.constant 0 : index
      %173 = vector.load %arg5[%c0_77, %172, %c0_78] : memref<1x8x1xf32, #tpu.memory_space<vmem>>, vector<1x1x1xf32>
      %174 = vector.shape_cast %173 : vector<1x1x1xf32> to vector<1x1xf32>
      %175 = vector.broadcast %171 : vector<1x1xf32> to vector<16x1xf32>
      %176 = arith.subf %24, %175 : vector<16x1xf32>
      %177 = vector.broadcast %174 : vector<1x1xf32> to vector<16x1xf32>
      %178 = arith.subf %28, %177 : vector<16x1xf32>
      %179 = arith.mulf %176, %176 : vector<16x1xf32>
      %180 = arith.mulf %178, %178 : vector<16x1xf32>
      %181 = arith.addf %179, %180 : vector<16x1xf32>
      %cst_79 = arith.constant 3.600000e+01 : f32
      %182 = vector.broadcast %cst_79 : f32 to vector<16x1xf32>
      %183 = arith.cmpf ole, %181, %182 : vector<16x1xf32>
      %c0_80 = arith.constant 0 : index
      %c0_81 = arith.constant 0 : index
      %c0_82 = arith.constant 0 : index
      %184 = vector.load %arg8[%c0_80, %c0_81, %c0_82] : memref<1x16x32xf32, #tpu.memory_space<vmem>>, vector<1x16x32xf32>
      %185 = vector.shape_cast %184 : vector<1x16x32xf32> to vector<16x32xf32>
      %cst_83 = arith.constant -1.000000e+30 : f32
      %186 = vector.shape_cast %183 : vector<16x1xi1> to vector<16x1xi1>
      %187 = vector.broadcast %186 : vector<16x1xi1> to vector<16x32xi1>
      %188 = vector.broadcast %cst_83 : f32 to vector<16x32xf32>
      %189 = arith.select %187, %185, %188 : vector<16x32xi1>, vector<16x32xf32>
      %cst_84 = arith.constant dense<0xFF800000> : vector<32xf32>
      %190 = vector.multi_reduction <maximumf>, %189, %cst_84 [0] : vector<16x32xf32> to vector<32xf32>
      %191 = vector.shape_cast %190 : vector<32xf32> to vector<1x32xf32>
      %192 = arith.index_cast %c5_i32 : i32 to index
      %c0_85 = arith.constant 0 : index
      %193 = vector.load %arg10[%192, %c0_85] : memref<8x32xf32, #tpu.memory_space<vmem>>, vector<1x32xf32>
      %194 = arith.maximumf %193, %191 : vector<1x32xf32>
      %195 = arith.index_cast %c5_i32 : i32 to index
      %c0_86 = arith.constant 0 : index
      %196 = vector.load %arg10[%195, %c0_86] : memref<8x32xf32, #tpu.memory_space<vmem>>, vector<1x32xf32>
      tpu.vector_store %arg10[%195, %c0_86], %194 {strides = array<i32>} : memref<8x32xf32, #tpu.memory_space<vmem>>, vector<1x32xf32>,
      %c6_i32 = arith.constant 6 : i32
      %c0_87 = arith.constant 0 : index
      %197 = arith.index_cast %c6_i32 : i32 to index
      %c0_88 = arith.constant 0 : index
      %198 = vector.load %arg4[%c0_87, %197, %c0_88] : memref<1x8x1xf32, #tpu.memory_space<vmem>>, vector<1x1x1xf32>
      %199 = vector.shape_cast %198 : vector<1x1x1xf32> to vector<1x1xf32>
      %c0_89 = arith.constant 0 : index
      %200 = arith.index_cast %c6_i32 : i32 to index
      %c0_90 = arith.constant 0 : index
      %201 = vector.load %arg5[%c0_89, %200, %c0_90] : memref<1x8x1xf32, #tpu.memory_space<vmem>>, vector<1x1x1xf32>
      %202 = vector.shape_cast %201 : vector<1x1x1xf32> to vector<1x1xf32>
      %203 = vector.broadcast %199 : vector<1x1xf32> to vector<16x1xf32>
      %204 = arith.subf %24, %203 : vector<16x1xf32>
      %205 = vector.broadcast %202 : vector<1x1xf32> to vector<16x1xf32>
      %206 = arith.subf %28, %205 : vector<16x1xf32>
      %207 = arith.mulf %204, %204 : vector<16x1xf32>
      %208 = arith.mulf %206, %206 : vector<16x1xf32>
      %209 = arith.addf %207, %208 : vector<16x1xf32>
      %cst_91 = arith.constant 3.600000e+01 : f32
      %210 = vector.broadcast %cst_91 : f32 to vector<16x1xf32>
      %211 = arith.cmpf ole, %209, %210 : vector<16x1xf32>
      %c0_92 = arith.constant 0 : index
      %c0_93 = arith.constant 0 : index
      %c0_94 = arith.constant 0 : index
      %212 = vector.load %arg8[%c0_92, %c0_93, %c0_94] : memref<1x16x32xf32, #tpu.memory_space<vmem>>, vector<1x16x32xf32>
      %213 = vector.shape_cast %212 : vector<1x16x32xf32> to vector<16x32xf32>
      %cst_95 = arith.constant -1.000000e+30 : f32
      %214 = vector.shape_cast %211 : vector<16x1xi1> to vector<16x1xi1>
      %215 = vector.broadcast %214 : vector<16x1xi1> to vector<16x32xi1>
      %216 = vector.broadcast %cst_95 : f32 to vector<16x32xf32>
      %217 = arith.select %215, %213, %216 : vector<16x32xi1>, vector<16x32xf32>
      %cst_96 = arith.constant dense<0xFF800000> : vector<32xf32>
      %218 = vector.multi_reduction <maximumf>, %217, %cst_96 [0] : vector<16x32xf32> to vector<32xf32>
      %219 = vector.shape_cast %218 : vector<32xf32> to vector<1x32xf32>
      %220 = arith.index_cast %c6_i32 : i32 to index
      %c0_97 = arith.constant 0 : index
      %221 = vector.load %arg10[%220, %c0_97] : memref<8x32xf32, #tpu.memory_space<vmem>>, vector<1x32xf32>
      %222 = arith.maximumf %221, %219 : vector<1x32xf32>
      %223 = arith.index_cast %c6_i32 : i32 to index
      %c0_98 = arith.constant 0 : index
      %224 = vector.load %arg10[%223, %c0_98] : memref<8x32xf32, #tpu.memory_space<vmem>>, vector<1x32xf32>
      tpu.vector_store %arg10[%223, %c0_98], %222 {strides = array<i32>} : memref<8x32xf32, #tpu.memory_space<vmem>>, vector<1x32xf32>,
      %c7_i32 = arith.constant 7 : i32
      %c0_99 = arith.constant 0 : index
      %225 = arith.index_cast %c7_i32 : i32 to index
      %c0_100 = arith.constant 0 : index
      %226 = vector.load %arg4[%c0_99, %225, %c0_100] : memref<1x8x1xf32, #tpu.memory_space<vmem>>, vector<1x1x1xf32>
      %227 = vector.shape_cast %226 : vector<1x1x1xf32> to vector<1x1xf32>
      %c0_101 = arith.constant 0 : index
      %228 = arith.index_cast %c7_i32 : i32 to index
      %c0_102 = arith.constant 0 : index
      %229 = vector.load %arg5[%c0_101, %228, %c0_102] : memref<1x8x1xf32, #tpu.memory_space<vmem>>, vector<1x1x1xf32>
      %230 = vector.shape_cast %229 : vector<1x1x1xf32> to vector<1x1xf32>
      %231 = vector.broadcast %227 : vector<1x1xf32> to vector<16x1xf32>
      %232 = arith.subf %24, %231 : vector<16x1xf32>
      %233 = vector.broadcast %230 : vector<1x1xf32> to vector<16x1xf32>
      %234 = arith.subf %28, %233 : vector<16x1xf32>
      %235 = arith.mulf %232, %232 : vector<16x1xf32>
      %236 = arith.mulf %234, %234 : vector<16x1xf32>
      %237 = arith.addf %235, %236 : vector<16x1xf32>
      %cst_103 = arith.constant 3.600000e+01 : f32
      %238 = vector.broadcast %cst_103 : f32 to vector<16x1xf32>
      %239 = arith.cmpf ole, %237, %238 : vector<16x1xf32>
      %c0_104 = arith.constant 0 : index
      %c0_105 = arith.constant 0 : index
      %c0_106 = arith.constant 0 : index
      %240 = vector.load %arg8[%c0_104, %c0_105, %c0_106] : memref<1x16x32xf32, #tpu.memory_space<vmem>>, vector<1x16x32xf32>
      %241 = vector.shape_cast %240 : vector<1x16x32xf32> to vector<16x32xf32>
      %cst_107 = arith.constant -1.000000e+30 : f32
      %242 = vector.shape_cast %239 : vector<16x1xi1> to vector<16x1xi1>
      %243 = vector.broadcast %242 : vector<16x1xi1> to vector<16x32xi1>
      %244 = vector.broadcast %cst_107 : f32 to vector<16x32xf32>
      %245 = arith.select %243, %241, %244 : vector<16x32xi1>, vector<16x32xf32>
      %cst_108 = arith.constant dense<0xFF800000> : vector<32xf32>
      %246 = vector.multi_reduction <maximumf>, %245, %cst_108 [0] : vector<16x32xf32> to vector<32xf32>
      %247 = vector.shape_cast %246 : vector<32xf32> to vector<1x32xf32>
      %248 = arith.index_cast %c7_i32 : i32 to index
      %c0_109 = arith.constant 0 : index
      %249 = vector.load %arg10[%248, %c0_109] : memref<8x32xf32, #tpu.memory_space<vmem>>, vector<1x32xf32>
      %250 = arith.maximumf %249, %247 : vector<1x32xf32>
      %251 = arith.index_cast %c7_i32 : i32 to index
      %c0_110 = arith.constant 0 : index
      %252 = vector.load %arg10[%251, %c0_110] : memref<8x32xf32, #tpu.memory_space<vmem>>, vector<1x32xf32>
      tpu.vector_store %arg10[%251, %c0_110], %250 {strides = array<i32>} : memref<8x32xf32, #tpu.memory_space<vmem>>, vector<1x32xf32>,
      %c8_i32 = arith.constant 8 : i32
    } else {
    }
    %c0_i32_4 = arith.constant 0 : i32
    %12 = arith.cmpi eq, %arg2, %c0_i32_4 : i32
    %13 = arith.extui %12 : i1 to i32
    %c0_i32_5 = arith.constant 0 : i32
    %14 = arith.cmpi ne, %13, %c0_i32_5 : i32
    scf.if %14 {
      %c0 = arith.constant 0 : index
      %c0_6 = arith.constant 0 : index
      %15 = vector.load %arg10[%c0, %c0_6] : memref<8x32xf32, #tpu.memory_space<vmem>>, vector<8x32xf32>
      %cst = arith.constant -5.000000e+29 : f32
      %16 = vector.broadcast %cst : f32 to vector<8x32xf32>
      %17 = arith.cmpf ogt, %15, %16 : vector<8x32xf32>
      %cst_7 = arith.constant 0.000000e+00 : f32
      %18 = vector.broadcast %cst_7 : f32 to vector<8x32xf32>
      %19 = arith.select %17, %15, %18 : vector<8x32xi1>, vector<8x32xf32>
      %c0_8 = arith.constant 0 : index
      %c0_9 = arith.constant 0 : index
      %c0_10 = arith.constant 0 : index
      %20 = vector.load %arg9[%c0_8, %c0_9, %c0_10] : memref<1x8x32xf32, #tpu.memory_space<vmem>>, vector<1x8x32xf32>
      %21 = vector.shape_cast %20 : vector<1x8x32xf32> to vector<8x32xf32>
      %22 = vector.shape_cast %19 : vector<8x32xf32> to vector<1x8x32xf32>
      tpu.vector_store %arg9[%c0_8, %c0_9, %c0_10], %22 {strides = array<i32>} : memref<1x8x32xf32, #tpu.memory_space<vmem>>, vector<1x8x32xf32>,
    } else {
    }
    return
  }
  func.func @transform_0(%arg0: i32, %arg1: i32, %arg2: i32, %arg3: memref<2xi32, #tpu.memory_space<smem>>) -> (i32, i32, i32) {
    %c0_i32 = arith.constant 0 : i32
    %c0_i32_0 = arith.constant 0 : i32
    return %arg0, %arg1, %c0_i32 : i32, i32, i32
  }
  func.func @transform_1(%arg0: i32, %arg1: i32, %arg2: i32, %arg3: memref<2xi32, #tpu.memory_space<smem>>) -> (i32, i32, i32) {
    %c0_i32 = arith.constant 0 : i32
    %c0_i32_0 = arith.constant 0 : i32
    return %arg0, %arg1, %c0_i32 : i32, i32, i32
  }
  func.func @transform_2(%arg0: i32, %arg1: i32, %arg2: i32, %arg3: memref<2xi32, #tpu.memory_space<smem>>) -> (i32, i32, i32) {
    %c0_i32 = arith.constant 0 : i32
    %c0_i32_0 = arith.constant 0 : i32
    return %arg0, %arg2, %c0_i32 : i32, i32, i32
  }
  func.func @transform_3(%arg0: i32, %arg1: i32, %arg2: i32, %arg3: memref<2xi32, #tpu.memory_space<smem>>) -> (i32, i32, i32) {
    %c0_i32 = arith.constant 0 : i32
    %c0_i32_0 = arith.constant 0 : i32
    return %arg0, %arg2, %c0_i32 : i32, i32, i32
  }
  func.func @transform_4(%arg0: i32, %arg1: i32, %arg2: i32, %arg3: memref<2xi32, #tpu.memory_space<smem>>) -> (i32, i32, i32) {
    %c0_i32 = arith.constant 0 : i32
    %c0_i32_0 = arith.constant 0 : i32
    return %arg0, %arg2, %c0_i32 : i32, i32, i32
  }
  func.func @transform_5(%arg0: i32, %arg1: i32, %arg2: i32, %arg3: memref<2xi32, #tpu.memory_space<smem>>) -> (i32, i32, i32) {
    %c0_i32 = arith.constant 0 : i32
    %c0_i32_0 = arith.constant 0 : i32
    return %arg0, %arg1, %c0_i32 : i32, i32, i32
  }
}

</mosaic_0001>

<bundles_post_ra>
// kernel: tpu_custom_call.1
= control target key start
LH: loop header
LB: loop body
LE: loop exit
PB: predicated region body
PF: predicated region fallthrough
CT: control target
= control target key end

     0   :  { %s1475_s0 = inlined_call_operand.vmem [shape: s32[2], index: 0, kind: input, shape index: {}]   ;;  %s1476_s1 = inlined_call_operand.vmem [shape: f32[2,8,1], index: 1, kind: input, shape index: {}]   ;;  %s1477_s2 = inlined_call_operand.vmem [shape: f32[2,8,1], index: 2, kind: input, shape index: {}]   ;;  %s1478_s3 = inlined_call_operand.vmem [shape: f32[2,16,1], index: 3, kind: input, shape index: {}]   ;;  %s1479_s4 = inlined_call_operand.vmem [shape: f32[2,16,1], index: 4, kind: input, shape index: {}]   ;;  %s1480_s5 = inlined_call_operand.vmem [shape: f32[2,16,32], index: 5, kind: input, shape index: {}]   ;;  %s1481_s6 = inlined_call_operand.hbm [shape: f32[2,8,32], index: 6, kind: output, shape index: {}]  }
   0x1   :  { %s11_s23 = sshll.u32 %s1475_s0, 4  ;;  %s12_s23 = int_to_ptr.vmem [resolvable:$true] %s11_s23 }
   0x2   :  { %s1075_s24 = scalar_lea.vmem %s12_s23, 16  ;;  %p1080_p1 = scmp.lt.s32.totalorder %s12_s23, %s12_s23 }
   0x3   :  { %p1076_p0 = scmp.ne.s32.totalorder %s12_s23, %s1075_s24  ;;  %p1081_p2 = scmp.lt.s32.totalorder %s1075_s24, %s1075_s24 }
   0x5   :  { %p1082_p3 = por %p1081_p2, %p1080_p1 }
   0x7   :  { %p1083_p4 = pnand %p1082_p3, %p1076_p0 }
   0x9   :  { %1086 = shalt.err (!%p1083_p4)  }
   0xa   :  { %s1169_s25 = smov [#allocation4]  }
   0xb   :  { %14 = dma.vmem_to_smem %s12_s23, 16, %s1169_s25, [#allocation3] }
   0xc   :  { %1139 = dma.done.wait [#allocation3], 16 }
   0xd   :  { %1140 = vsyncadd [#allocation3], 4294967280 }
   0xe   :  { %16 = sfence }
   0xf   :  { %17 = vsyncpa [#allocation6], 0 }
  0x10   :  { %19 = vsyncpa [#allocation6 + $0x1], 0  ;;  %s1211_s26 = smov 0   ;;  %s1213_s27 = smov 0  }
  0x11   :  { %s1215_s0 = smov 0   ;;  %s1217_s28 = smov 0  }
  0x12   :  { %s1219_s29 = smov 0   ;;  %s1221_s30 = smov 0  }
  0x13 LB: > { %1486 = sst [smem:[#allocation9_spill]] %s1155_s0  ;;  %s977_s7 = sadd.s32 4294967295, %s1167_s30   ;;  %s1167_s30 = sphi %s1221_s30, %s25_s30   ;;  %s1163_s29 = sphi %s1219_s29, %s1496_s29   ;;  %s1159_s28 = sphi %s1217_s28, %s1495_s28   ;;  %s1155_s0 = sphi %s1215_s0, %s1494_s0   ;;  %s1151_s27 = sphi %s1213_s27, %s1498_s27   ;;  %s1147_s26 = sphi %s1211_s26, %s1497_s26  }
  0x14   : > { %1487 = sst [smem:[#allocation10_spill]] %s1163_s29  ;;  %s978_s8 = sadd.s32 4294967294, %s1167_s30  }
  0x15   : > { %s44_s9 = sadd.s32 1, %s1163_s29  ;;  %s193_s10 = sadd.s32 1, %s1155_s0 }
  0x16   : > { %p46_p5 = scmp.ge.s32.totalorder %s44_s9, 2  ;;  %p203_p6 = scmp.ne.s32.totalorder %s1155_s0, %s1151_s27 }
  0x17   : > { %p204_p7 = scmp.eq.s32.totalorder %s977_s7, 1  ;;  %p209_p8 = scmp.ne.s32.totalorder %s1151_s27, %s1147_s26 }
  0x18   : > { %s1500_s9 = smov (%p46_p5, %s44_s9), 0  ;;  %p210_p10 = scmp.eq.s32.totalorder %s978_s8, 1 }
  0x19   : > { %1488 = sst [smem:[#allocation11_spill]] %s1500_s9  ;;  %p1251_p9 = por %p204_p7, %p203_p6 }
  0x1a   : > { %s188_s12 = ssub.s32 %s1163_s29, %s1500_s9  ;;  %p981_p11 = scmp.ge.s32.totalorder %s1167_s30, 1 }
  0x1b   : > { %p191_p12 = scmp.eq.s32.totalorder %s188_s12, 0  ;;  %p1258_p13 = por %p210_p10, %p209_p8 }
  0x1c   : > { %p287_p0 = scmp.lt.s32.totalorder %s1167_s30, 3 }
  0x1d   : > { %s1264_s14 = scalar_select %p191_p12, %s1155_s0, %s193_s10  }
  0x1e   : > { %p288_p1 = pnand %p981_p11, %p287_p0 }
  0x1f   : > { %1491 = sst [smem:[#allocation12_spill]] %s1264_s14  ;;  %s1482_s15 = sand.u32 (!%p288_p1), 1, %s1151_s27   ;;  %vm399_vm0 = vcmask (!%p288_p1), 261120   ;;  %v1170_v0 = vmov (!%p288_p1), -1e+30  }
  0x20   : > { %291 = sbr.rel (%p288_p1) target bundleno = 258 (0x102), region = 40  ;;  %p351_p2 = scmp.lt.s32.totalorder (!%p288_p1), %s1159_s28, 1  ;;  %400 = vst.msk [vmem:[#allocation2] sm:$0xff] (!%p288_p1), %vm399_vm0, %v1170_v0 }
  0x21   : > { %s1270_s16 = sshll.u32 (!%p288_p1), %s1482_s15, 3  ;;  %s403_s17 = sld [smem:[#allocation4 + %s1159_s28]] (!%p288_p1) }
  0x22   : > { %s350_s21 = scalar_lea.vmem (!%p288_p1), [#allocation5], %s1270_s16 }
  0x27   : > { %s352_s18 = scalar_select %p351_p2, %s1159_s28, 1 }
  0x28   : > { %p991_p3 = scmp.le.s32.totalorder %s403_s17, 0 }
  0x29   : > { %s983_s19 = sshll.u32 %s352_s18, 3  ;;  %s1012_s20 = sshll.u32 %s352_s18, 4  ;;  %v1171_v4 = vmov (!%p991_p3), 0  }
  0x2a   : > { %s1278_s23 = scalar_lea.vmem %s1476_s1, %s983_s19  ;;  %s1283_s7 = scalar_lea.vmem %s1477_s2, %s983_s19  ;;  %1074 = vset.pattern.permute.xlu1 (!%p991_p3), %v1171_v4  ;;  %1073 = vset.pattern.permute.xlu0 (!%p991_p3), %v1171_v4 }
  0x2b   : > { %s373_s12 = scalar_lea.vmem %s1478_s3, %s1012_s20  ;;  %s383_s29 = scalar_lea.vmem %s1479_s4, %s1012_s20  ;;  %v994_v3 = vld [vmem:[%s1278_s23 + $0x1] ss:$0 sm:$0xff] (!%p991_p3)  ;;  %v992_v7 = vld [vmem:[%s1278_s23] ss:$0 sm:$0xff] (!%p991_p3)  ;;  %v996_v14 = vld [vmem:[%s1278_s23 + $0x2] ss:$0 sm:$0xff] (!%p991_p3) }
  0x2c   : > { %s1294_s0 = scalar_lea.vmem %s1480_s5, %s1012_s20  ;;  %407 = sbr.rel (%p991_p3) target bundleno = 233 (0xe9), region = 48  ;;  %v1297_v1 = vld [vmem:[%s373_s12] sm:$0xff] (!%p991_p3)  ;;  %v1311_v12 = vld [vmem:[%s373_s12 + $0x8] sm:$0xff] (!%p991_p3) }
  0x2d   : > { %v1299_v2 = vld [vmem:[%s383_s29] sm:$0xff] (!%p991_p3)  ;;  %v481_v6 = vsub.f32 (!%p991_p3), %v1297_v1, %v994_v3  ;;  %v431_v10 = vsub.f32 (!%p991_p3), %v1297_v1, %v992_v7  ;;  %v1313_v13 = vld [vmem:[%s383_s29 + $0x8] sm:$0xff] (!%p991_p3)  ;;  %v482_v16 = vsub.f32 (!%p991_p3), %v1311_v12, %v994_v3  ;;  %v432_v18 = vsub.f32 (!%p991_p3), %v1311_v12, %v992_v7 }
  0x2e   : > { %v995_v5 = vld [vmem:[%s1283_s7 + $0x1] ss:$0 sm:$0xff] (!%p991_p3)  ;;  %v993_v8 = vld [vmem:[%s1283_s7] ss:$0 sm:$0xff] (!%p991_p3)  ;;  %v997_v19 = vld [vmem:[%s1283_s7 + $0x2] ss:$0 sm:$0xff] (!%p991_p3)  ;;  %v530_v27 = vsub.f32 (!%p991_p3), %v1311_v12, %v996_v14  ;;  %v529_v34 = vsub.f32 (!%p991_p3), %v1297_v1, %v996_v14 }
  0x2f   : > { %v487_v9 = vsub.f32 (!%p991_p3), %v1299_v2, %v995_v5  ;;  %v437_v11 = vsub.f32 (!%p991_p3), %v1299_v2, %v993_v8  ;;  %v489_v15 = vmul.f32 (!%p991_p3), %v481_v6, %v481_v6  ;;  %v488_v17 = vsub.f32 (!%p991_p3), %v1313_v13, %v995_v5  ;;  %v998_v38 = vld [vmem:[%s1278_s23 + $0x3] ss:$0 sm:$0xff] (!%p991_p3)  ;;  %v1000_v43 = vld [vmem:[%s1278_s23 + $0x4] ss:$0 sm:$0xff] (!%p991_p3)  ;;  %v1002_v59 = vld [vmem:[%s1278_s23 + $0x5] ss:$0 sm:$0xff] (!%p991_p3) }
  0x30   : > { %v439_v21 = vmul.f32 (!%p991_p3), %v431_v10, %v431_v10  ;;  %v438_v23 = vsub.f32 (!%p991_p3), %v1313_v13, %v993_v8  ;;  %v490_v24 = vmul.f32 (!%p991_p3), %v482_v16, %v482_v16  ;;  %v440_v26 = vmul.f32 (!%p991_p3), %v432_v18, %v432_v18  ;;  %v999_v39 = vld [vmem:[%s1283_s7 + $0x3] ss:$0 sm:$0xff] (!%p991_p3)  ;;  %v1001_v51 = vld [vmem:[%s1283_s7 + $0x4] ss:$0 sm:$0xff] (!%p991_p3)  ;;  %v1003_v60 = vld [vmem:[%s1283_s7 + $0x5] ss:$0 sm:$0xff] (!%p991_p3) }
  0x31   : > { %v491_v20 = vmul.f32 (!%p991_p3), %v487_v9, %v487_v9  ;;  %v441_v22 = vmul.f32 (!%p991_p3), %v437_v11, %v437_v11  ;;  %v492_v25 = vmul.f32 (!%p991_p3), %v488_v17, %v488_v17  ;;  %v536_v31 = vsub.f32 (!%p991_p3), %v1313_v13, %v997_v19  ;;  %v1004_v16 = vld [vmem:[%s1278_s23 + $0x6] ss:$0 sm:$0xff] (!%p991_p3) }
  0x32   : > { %v442_v30 = vmul.f32 (!%p991_p3), %v438_v23, %v438_v23  ;;  %v538_v33 = vmul.f32 (!%p991_p3), %v530_v27, %v530_v27  ;;  %v535_v35 = vsub.f32 (!%p991_p3), %v1299_v2, %v997_v19  ;;  %v537_v42 = vmul.f32 (!%p991_p3), %v529_v34, %v529_v34  ;;  %v1005_v17 = vld [vmem:[%s1283_s7 + $0x6] ss:$0 sm:$0xff] (!%p991_p3) }
  0x33   : > { %v493_v28 = vadd.f32 %v491_v20, %v489_v15  ;;  %v443_v29 = vadd.f32 %v441_v22, %v439_v21  ;;  %v494_v32 = vadd.f32 %v492_v25, %v490_v24  ;;  %v540_v37 = vmul.f32 %v536_v31, %v536_v31  ;;  %v1007_v31 = vld [vmem:[%s1283_s7 + $0x7] ss:$0 sm:$0xff] }
  0x34   : > { %v444_v36 = vadd.f32 %v442_v30, %v440_v26  ;;  %v539_v46 = vmul.f32 %v535_v35, %v535_v35  ;;  %v578_v48 = vsub.f32 %v1311_v12, %v998_v38  ;;  %v584_v49 = vsub.f32 %v1313_v13, %v999_v39 }
  0x35   : > { %vm495_vm1 = vcmp.le.f32.partialorder %v493_v28, 36.0  ;;  %vm445_vm2 = vcmp.le.f32.partialorder %v443_v29, 36.0  ;;  %vm496_vm3 = vcmp.le.f32.partialorder %v494_v32, 36.0  ;;  %v542_v45 = vadd.f32 %v540_v37, %v538_v33  ;;  %v1006_v28 = vld [vmem:[%s1278_s23 + $0x7] ss:$0 sm:$0xff] }
  0x36   : > { %v499_v40 = vsel %vm495_vm1, 1, %v1171_v4  ;;  %v449_v41 = vsel %vm445_vm2, 1, %v1171_v4  ;;  %v500_v44 = vsel %vm496_vm3, 1, %v1171_v4  ;;  %vm446_vm4 = vcmp.le.f32.partialorder %v444_v36, 36.0 }
  0x37   : > { %502 = vperm.xlu1 %1074, %v499_v40   ;;  %452 = vperm.xlu0 %1073, %v449_v41   ;;  %v450_v47 = vsel %vm446_vm4, 1, %v1171_v4  ;;  %v577_v50 = vsub.f32 %v1297_v1, %v998_v38  ;;  %vm544_vm5 = vcmp.le.f32.partialorder %v542_v45, 36.0  ;;  %v541_v52 = vadd.f32 %v539_v46, %v537_v42 }
  0x38   : > { %v583_v53 = vsub.f32 %v1299_v2, %v999_v39  ;;  %v626_v54 = vsub.f32 %v1311_v12, %v1000_v43  ;;  %v548_v55 = vsel %vm544_vm5, 1, %v1171_v4  ;;  %v586_v56 = vmul.f32 %v578_v48, %v578_v48 }
  0x39   : > { %v588_v57 = vmul.f32 %v584_v49, %v584_v49  ;;  %v585_v58 = vmul.f32 %v577_v50, %v577_v50  ;;  %vm543_vm6 = vcmp.le.f32.partialorder %v541_v52, 36.0  ;;  %v632_v62 = vsub.f32 %v1313_v13, %v1001_v51 }
  0x3a   : > { %v587_v61 = vmul.f32 %v583_v53, %v583_v53  ;;  %v634_v63 = vmul.f32 %v626_v54, %v626_v54  ;;  %v547_v0 = vsel %vm543_vm6, 1, %v1171_v4  ;;  %v625_v5 = vsub.f32 %v1297_v1, %v1000_v43 }
  0x3b   : > { %505 = vperm.xlu1 %1074, %v500_v44   ;;  %455 = vperm.xlu0 %1073, %v450_v47   ;;  %v590_v3 = vadd.f32 %v588_v57, %v586_v56  ;;  %v631_v6 = vsub.f32 %v1299_v2, %v1001_v51  ;;  %v636_v8 = vmul.f32 %v632_v62, %v632_v62  ;;  %v1372_v57 = vld [vmem:[%s1294_s0] sm:$0xff] }
  0x3c   : > { %v589_v7 = vadd.f32 %v587_v61, %v585_v58  ;;  %v674_v9 = vsub.f32 %v1311_v12, %v1002_v59  ;;  %v680_v10 = vsub.f32 %v1313_v13, %v1003_v60  ;;  %v633_v11 = vmul.f32 %v625_v5, %v625_v5  ;;  %v1375_v58 = vld [vmem:[%s1294_s0 + $0x8] sm:$0xff] }
  0x3d   : > { %vm592_vm7 = vcmp.le.f32.partialorder %v590_v3, 36.0  ;;  %v635_v14 = vmul.f32 %v631_v6, %v631_v6  ;;  %v673_v15 = vsub.f32 %v1297_v1, %v1002_v59  ;;  %v638_v19 = vadd.f32 %v636_v8, %v634_v63 }
  0x3e   : > { %v596_v18 = vsel %vm592_vm7, 1, %v1171_v4  ;;  %vm591_vm8 = vcmp.le.f32.partialorder %v589_v7, 36.0  ;;  %v682_v20 = vmul.f32 %v674_v9, %v674_v9  ;;  %v684_v23 = vmul.f32 %v680_v10, %v680_v10 }
  0x3f   : > { %553 = vperm.xlu1 %1074, %v548_v55   ;;  %550 = vperm.xlu0 %1073, %v547_v0   ;;  %v595_v21 = vsel %vm591_vm8, 1, %v1171_v4  ;;  %v637_v22 = vadd.f32 %v635_v14, %v633_v11  ;;  %v679_v24 = vsub.f32 %v1299_v2, %v1003_v60  ;;  %vm640_vm9 = vcmp.le.f32.partialorder %v638_v19, 36.0 }
  0x40   : > { %v681_v25 = vmul.f32 %v673_v15, %v673_v15  ;;  %v722_v26 = vsub.f32 %v1311_v12, %v1004_v16  ;;  %v728_v27 = vsub.f32 %v1313_v13, %v1005_v17  ;;  %v686_v29 = vadd.f32 %v684_v23, %v682_v20 }
  0x41   : > { %vm639_vm10 = vcmp.le.f32.partialorder %v637_v22, 36.0  ;;  %v683_v30 = vmul.f32 %v679_v24, %v679_v24  ;;  %v644_v32 = vsel %vm640_vm9, 1, %v1171_v4  ;;  %v721_v35 = vsub.f32 %v1297_v1, %v1004_v16 }
  0x42   : > { %v730_v33 = vmul.f32 %v722_v26, %v722_v26  ;;  %v732_v34 = vmul.f32 %v728_v27, %v728_v27  ;;  %v643_v36 = vsel %vm639_vm10, 1, %v1171_v4  ;;  %v727_v38 = vsub.f32 %v1299_v2, %v1005_v17 }
  0x43   : > { %601 = vperm.xlu1 %1074, %v596_v18   ;;  %598 = vperm.xlu0 %1073, %v595_v21   ;;  %v685_v37 = vadd.f32 %v683_v30, %v681_v25  ;;  %v770_v39 = vsub.f32 %v1311_v12, %v1006_v28  ;;  %vm688_vm11 = vcmp.le.f32.partialorder %v686_v29, 36.0  ;;  %v729_v41 = vmul.f32 %v721_v35, %v721_v35 }
  0x44   : > { %v734_v40 = vadd.f32 %v732_v34, %v730_v33  ;;  %v776_v42 = vsub.f32 %v1313_v13, %v1007_v31  ;;  %v731_v43 = vmul.f32 %v727_v38, %v727_v38  ;;  %v769_v45 = vsub.f32 %v1297_v1, %v1006_v28 }
  0x45   : > { %vm687_vm12 = vcmp.le.f32.partialorder %v685_v37, 36.0  ;;  %v778_v44 = vmul.f32 %v770_v39, %v770_v39  ;;  %v775_v47 = vsub.f32 %v1299_v2, %v1007_v31  ;;  %v692_v48 = vsel %vm688_vm11, 1, %v1171_v4 }
  0x46   : > { %v780_v46 = vmul.f32 %v776_v42, %v776_v42  ;;  %v691_v49 = vsel %vm687_vm12, 1, %v1171_v4  ;;  %v733_v12 = vadd.f32 %v731_v43, %v729_v41  ;;  %v777_v50 = vmul.f32 %v769_v45, %v769_v45  ;;  %v471_v42 = vld [vmem:[#allocation2] sm:$0x1] }
  0x47   : > { %649 = vperm.xlu1 %1074, %v644_v32   ;;  %646 = vperm.xlu0 %1073, %v643_v36   ;;  %vm736_vm13 = vcmp.le.f32.partialorder %v734_v40, 36.0  ;;  %v779_v52 = vmul.f32 %v775_v47, %v775_v47  ;;  %vm473_vm10 = vcmask 253952   ;;  %v520_v36 = vld [vmem:[#allocation2 + $0x1] sm:$0x1] }
  0x48   : > { %v782_v51 = vadd.f32 %v780_v46, %v778_v44  ;;  %vm735_vm14 = vcmp.le.f32.partialorder %v733_v12, 36.0  ;;  %v740_v1 = vsel %vm736_vm13, 1, %v1171_v4 }
  0x49   : > { %v781_v13 = vadd.f32 %v779_v52, %v777_v50  ;;  %v739_v53 = vsel %vm735_vm14, 1, %v1171_v4 }
  0x4a   : > { %vm784_vm15 = vcmp.le.f32.partialorder %v782_v51, 36.0 }
  0x4b   : > { %697 = vperm.xlu1 %1074, %v692_v48   ;;  %694 = vperm.xlu0 %1073, %v691_v49   ;;  %vm783_vm1 = vcmp.le.f32.partialorder %v781_v13, 36.0  ;;  %v788_v2 = vsel %vm784_vm15, 1, %v1171_v4 }
  0x4c   : > { %v787_v54 = vsel %vm783_vm1, 1, %v1171_v4 }
  0x4f   : > { %745 = vperm.xlu1 %1074, %v740_v1   ;;  %742 = vperm.xlu0 %1073, %v739_v53   ;;  %v568_v53 = vld [vmem:[#allocation2 + $0x2] sm:$0x1] }
  0x53   : > { %793 = vperm.xlu1 %1074, %v788_v2   ;;  %790 = vperm.xlu0 %1073, %v787_v54  }
  0xb6   : > { %v503_v55 = vpop.permute.xlu1 %502  ;;  %v453_v56 = vpop.permute.xlu0 %452 }
  0xb7   : > { %vm507_vm2 = vcmp.eq.s32.totalorder %v503_v55, 1  ;;  %vm457_vm3 = vcmp.eq.s32.totalorder %v453_v56, 1 }
  0xb8   : > { %v509_v59 = vsel %vm507_vm2, %v1372_v57, -1e+30  ;;  %v459_v60 = vsel %vm457_vm3, %v1372_v57, -1e+30 }
  0xb9   : > { %v511_v0 = vsel %vm399_vm0, %v509_v59, -inf  ;;  %v462_v3 = vsel %vm399_vm0, %v459_v60, -inf }
  0xba   : > { %v506_v61 = vpop.permute.xlu1 %505  ;;  %v456_v62 = vpop.permute.xlu0 %455 }
  0xbb   : > { %vm508_vm4 = vcmp.eq.s32.totalorder %v506_v61, 1  ;;  %vm458_vm5 = vcmp.eq.s32.totalorder %v456_v62, 1 }
  0xbc   : > { %v510_v4 = vsel %vm508_vm4, %v1375_v58, -1e+30  ;;  %v460_v63 = vsel %vm458_vm5, %v1375_v58, -1e+30 }
  0xbd   : > { %v512_v5 = vsel %vm399_vm0, %v510_v4, -inf  ;;  %v463_v6 = vsel %vm399_vm0, %v460_v63, -inf }
  0xbe   : > { %v513_v7 = vmax.f32 %v511_v0, %v512_v5  ;;  %v464_v8 = vmax.f32 %v462_v3, %v463_v6  ;;  %v554_v9 = vpop.permute.xlu1 %553  ;;  %v551_v10 = vpop.permute.xlu0 %550 }
  0xbf   : > { %vm556_vm6 = vcmp.eq.s32.totalorder %v554_v9, 1  ;;  %vm555_vm7 = vcmp.eq.s32.totalorder %v551_v10, 1 }
  0xc0   : > { %v514_v11 = vrot.slane %v513_v7, 4  ;;  %v465_v14 = vrot.slane %v464_v8, 4  ;;  %v558_v15 = vsel %vm556_vm6, %v1375_v58, -1e+30  ;;  %v557_v16 = vsel %vm555_vm7, %v1372_v57, -1e+30 }
  0xc1   : > { %v560_v17 = vsel %vm399_vm0, %v558_v15, -inf  ;;  %v559_v18 = vsel %vm399_vm0, %v557_v16, -inf }
  0xc2   : > { %v515_v19 = vmax.f32 %v513_v7, %v514_v11  ;;  %v466_v20 = vmax.f32 %v464_v8, %v465_v14  ;;  %v561_v21 = vmax.f32 %v559_v18, %v560_v17  ;;  %v602_v22 = vpop.permute.xlu1 %601  ;;  %v599_v23 = vpop.permute.xlu0 %598  ;;  %v616_v14 = vld [vmem:[#allocation2 + $0x3] sm:$0x1] }
  0xc3   : > { %vm604_vm8 = vcmp.eq.s32.totalorder %v602_v22, 1  ;;  %vm603_vm9 = vcmp.eq.s32.totalorder %v599_v23, 1 }
  0xc4   : > { %v516_v24 = vrot.slane %v515_v19, 2  ;;  %v467_v25 = vrot.slane %v466_v20, 2  ;;  %v562_v26 = vrot.slane %v561_v21, 4  ;;  %v606_v27 = vsel %vm604_vm8, %v1375_v58, -1e+30 }
  0xc5   : > { %v608_v28 = vsel %vm399_vm0, %v606_v27, -inf  ;;  %v605_v29 = vsel %vm603_vm9, %v1372_v57, -1e+30  ;;  %v664_v27 = vld [vmem:[#allocation2 + $0x4] sm:$0x1] }
  0xc6   : > { %v517_v30 = vmax.f32 %v515_v19, %v516_v24  ;;  %v468_v31 = vmax.f32 %v466_v20, %v467_v25  ;;  %v563_v32 = vmax.f32 %v561_v21, %v562_v26  ;;  %v607_v33 = vsel %vm399_vm0, %v605_v29, -inf  ;;  %v650_v34 = vpop.permute.xlu1 %649  ;;  %v647_v35 = vpop.permute.xlu0 %646 }
  0xc7   : > { %v609_v37 = vmax.f32 %v607_v33, %v608_v28  ;;  %vm652_vm11 = vcmp.eq.s32.totalorder %v650_v34, 1  ;;  %vm651_vm12 = vcmp.eq.s32.totalorder %v647_v35, 1 }
  0xc8   : > { %v518_v38 = vrot.slane %v517_v30, 1  ;;  %v469_v39 = vrot.slane %v468_v31, 1  ;;  %v564_v40 = vrot.slane %v563_v32, 2  ;;  %v654_v41 = vsel %vm652_vm11, %v1375_v58, -1e+30 }
  0xc9   : > { %v610_v43 = vrot.slane %v609_v37, 4  ;;  %v656_v44 = vsel %vm399_vm0, %v654_v41, -inf  ;;  %v653_v45 = vsel %vm651_vm12, %v1372_v57, -1e+30 }
  0xca   : > { %v519_v46 = vmax.f32 %v517_v30, %v518_v38  ;;  %v470_v47 = vmax.f32 %v468_v31, %v469_v39  ;;  %v565_v48 = vmax.f32 %v563_v32, %v564_v40  ;;  %v655_v49 = vsel %vm399_vm0, %v653_v45, -inf  ;;  %v698_v12 = vpop.permute.xlu1 %697  ;;  %v695_v50 = vpop.permute.xlu0 %694  ;;  %v712_v38 = vld [vmem:[#allocation2 + $0x5] sm:$0x1]  ;;  %v760_v45 = vld [vmem:[#allocation2 + $0x6] sm:$0x1] }
  0xcb   : > { %v611_v51 = vmax.f32 %v609_v37, %v610_v43  ;;  %v657_v52 = vmax.f32 %v655_v49, %v656_v44  ;;  %vm700_vm13 = vcmp.eq.s32.totalorder %v698_v12, 1  ;;  %vm699_vm14 = vcmp.eq.s32.totalorder %v695_v50, 1  ;;  %v808_v12 = vld [vmem:[#allocation2 + $0x7] sm:$0x1] }
  0xcc   : > { %v521_v13 = vmax.f32 %v520_v36, %v519_v46  ;;  %v472_v1 = vmax.f32 %v471_v42, %v470_v47  ;;  %v566_v2 = vrot.slane %v565_v48, 1  ;;  %v702_v54 = vsel %vm700_vm13, %v1375_v58, -1e+30 }
  0xcd   : > { %v612_v55 = vrot.slane %v611_v51, 2  ;;  %v658_v56 = vrot.slane %v657_v52, 4  ;;  %v704_v59 = vsel %vm399_vm0, %v702_v54, -inf  ;;  %v701_v60 = vsel %vm699_vm14, %v1372_v57, -1e+30 }
  0xce   : > { %522 = vst.msk [vmem:[#allocation2 + $0x1] sm:$0x1] %vm473_vm10, %v521_v13  ;;  %474 = vst.msk [vmem:[#allocation2] sm:$0x1] %vm473_vm10, %v472_v1  ;;  %v567_v61 = vmax.f32 %v565_v48, %v566_v2  ;;  %v703_v62 = vsel %vm399_vm0, %v701_v60, -inf  ;;  %v746_v4 = vpop.permute.xlu1 %745  ;;  %v743_v63 = vpop.permute.xlu0 %742 }
  0xcf   : > { %v613_v0 = vmax.f32 %v611_v51, %v612_v55  ;;  %v659_v3 = vmax.f32 %v657_v52, %v658_v56  ;;  %v705_v5 = vmax.f32 %v703_v62, %v704_v59  ;;  %vm748_vm15 = vcmp.eq.s32.totalorder %v746_v4, 1 }
  0xd0   : > { %v569_v6 = vmax.f32 %v568_v53, %v567_v61  ;;  %v750_v7 = vsel %vm748_vm15, %v1375_v58, -1e+30  ;;  %vm747_vm1 = vcmp.eq.s32.totalorder %v743_v63, 1 }
  0xd1   : > { %v614_v8 = vrot.slane %v613_v0, 1  ;;  %v660_v9 = vrot.slane %v659_v3, 2  ;;  %v706_v10 = vrot.slane %v705_v5, 4  ;;  %v752_v11 = vsel %vm399_vm0, %v750_v7, -inf }
  0xd2   : > { %570 = vst.msk [vmem:[#allocation2 + $0x2] sm:$0x1] %vm473_vm10, %v569_v6  ;;  %v749_v15 = vsel %vm747_vm1, %v1372_v57, -1e+30  ;;  %v794_v16 = vpop.permute.xlu1 %793  ;;  %v791_v17 = vpop.permute.xlu0 %790 }
  0xd3   : > { %v615_v18 = vmax.f32 %v613_v0, %v614_v8  ;;  %v661_v19 = vmax.f32 %v659_v3, %v660_v9  ;;  %v707_v20 = vmax.f32 %v705_v5, %v706_v10  ;;  %v751_v21 = vsel %vm399_vm0, %v749_v15, -inf }
  0xd4   : > { %v753_v22 = vmax.f32 %v751_v21, %v752_v11  ;;  %vm796_vm2 = vcmp.eq.s32.totalorder %v794_v16, 1  ;;  %vm795_vm3 = vcmp.eq.s32.totalorder %v791_v17, 1 }
  0xd5   : > { %v617_v23 = vmax.f32 %v616_v14, %v615_v18  ;;  %v662_v24 = vrot.slane %v661_v19, 1  ;;  %v708_v25 = vrot.slane %v707_v20, 2  ;;  %v798_v26 = vsel %vm796_vm2, %v1375_v58, -1e+30 }
  0xd6   : > { %v754_v28 = vrot.slane %v753_v22, 4  ;;  %v800_v29 = vsel %vm399_vm0, %v798_v26, -inf  ;;  %v797_v30 = vsel %vm795_vm3, %v1372_v57, -1e+30 }
  0xd7   : > { %618 = vst.msk [vmem:[#allocation2 + $0x3] sm:$0x1] %vm473_vm10, %v617_v23  ;;  %v663_v31 = vmax.f32 %v661_v19, %v662_v24  ;;  %v709_v32 = vmax.f32 %v707_v20, %v708_v25  ;;  %v799_v33 = vsel %vm399_vm0, %v797_v30, -inf }
  0xd8   : > { %v755_v34 = vmax.f32 %v753_v22, %v754_v28  ;;  %v801_v35 = vmax.f32 %v799_v33, %v800_v29 }
  0xd9   : > { %v665_v36 = vmax.f32 %v664_v27, %v663_v31  ;;  %v710_v37 = vrot.slane %v709_v32, 1 }
  0xda   : > { %v756_v39 = vrot.slane %v755_v34, 2  ;;  %v802_v40 = vrot.slane %v801_v35, 4 }
  0xdb   : > { %666 = vst.msk [vmem:[#allocation2 + $0x4] sm:$0x1] %vm473_vm10, %v665_v36  ;;  %v711_v58 = vmax.f32 %v709_v32, %v710_v37 }
  0xdc   : > { %v757_v41 = vmax.f32 %v755_v34, %v756_v39  ;;  %v803_v42 = vmax.f32 %v801_v35, %v802_v40 }
  0xdd   : > { %v713_v43 = vmax.f32 %v712_v38, %v711_v58 }
  0xde   : > { %v758_v57 = vrot.slane %v757_v41, 1  ;;  %v804_v44 = vrot.slane %v803_v42, 2 }
  0xdf   : > { %714 = vst.msk [vmem:[#allocation2 + $0x5] sm:$0x1] %vm473_vm10, %v713_v43 }
  0xe0   : > { %v759_v46 = vmax.f32 %v757_v41, %v758_v57  ;;  %v805_v47 = vmax.f32 %v803_v42, %v804_v44 }
  0xe2   : > { %v761_v48 = vmax.f32 %v760_v45, %v759_v46  ;;  %v806_v49 = vrot.slane %v805_v47, 1 }
  0xe4   : > { %762 = vst.msk [vmem:[#allocation2 + $0x6] sm:$0x1] %vm473_vm10, %v761_v48  ;;  %v807_v50 = vmax.f32 %v805_v47, %v806_v49 }
  0xe6   : > { %v809_v51 = vmax.f32 %v808_v12, %v807_v50 }
  0xe8   : > { %810 = vst.msk [vmem:[#allocation2 + $0x7] sm:$0x1] %vm473_vm10, %v809_v51 }
  0xe9 PF: > { %s1009_s0 = sshll.u32 %s1159_s28, 7  ;;  %s834_s15 = sshll.u32 %s350_s21, 4  ;;  %s1425_s15 = int_to_ptr.vmem [resolvable:$true] %s834_s15 }
  0xea   : > { %s1421_s14 = scalar_lea.hbm %s1481_s6, %s1009_s0  ;;  %s1492_s17 = sand.u32 1, %s1151_s27  }
  0xeb   : > { %s820_s19 = scalar_lea.sflag [#allocation6], %s1492_s17  ;;  %s1087_s28 = scalar_lea.vmem %s1425_s15, 128 }
  0xec   : > { %p1088_p4 = scmp.ne.s32.totalorder %s1425_s15, %s1087_s28  ;;  %s1172_s20 = smov [#allocation5]  }
  0xed   : > { %s1091_s22 = sshll.u32 %s1172_s20, 4  ;;  %s1092_s22 = int_to_ptr.vmem [resolvable:$false] %s1091_s22 }
  0xee   : > { %p1089_p5 = pnand %p1088_p4, %p1251_p9  ;;  %s1093_s23 = scalar_lea.vmem %s1092_s22, 256 }
  0xef   : > { %v814_v52 = vld [vmem:[#allocation2] sm:$0xff]  ;;  %p1094_p7 = scmp.lt.s32.totalorder %s1425_s15, %s1092_s22  ;;  %p1095_p8 = scmp.lt.s32.totalorder %s1093_s23, %s1087_s28 }
  0xf0   : > { %vm815_vm4 = vcmp.gt.f32.partialorder %v814_v52, -5e+29  ;;  %p1090_p6 = pneg %p1089_p5 }
  0xf1   : > { %v816_v13 = vsel %vm815_vm4, %v814_v52, 0.0  ;;  %p1096_p10 = por %p1095_p8, %p1094_p7 }
  0xf2   : > { %818 = vst.msk [vmem:[%s350_s21] sm:$0xff] %vm399_vm0, %v816_v13 }
  0xf3   : > { %p1097_p11 = pnand %p1096_p10, %p1090_p6 }
  0xf5   : > { %1100 = shalt.err (!%p1097_p11)
}
  0xf6   : > { %s1101_s16 = scalar_lea.hbm %s1421_s14, 128  ;;  %s1105_s7 = scalar_lea.hbm %s1481_s6, 256 }
  0xf7   : > { %p1102_p12 = scmp.ne.s32.totalorder %s1421_s14, %s1101_s16  ;;  %p1106_p2 = scmp.lt.u32.totalorder %s1421_s14, %s1481_s6 }
  0xf8   : > { %p1107_p3 = scmp.lt.u32.totalorder %s1105_s7, %s1101_s16  ;;  %p1109_p5 = scmp.lt.u32.totalorder %s1101_s16, %s1421_s14 }
  0xf9   : > { %p1103_p0 = pnand %p1102_p12, %p1251_p9 }
  0xfa   : > { %p1108_p4 = por %p1107_p3, %p1106_p2 }
  0xfb   : > { %p1104_p1 = pneg %p1103_p0 }
  0xfc   : > { %p1110_p6 = por %p1109_p5, %p1108_p4 }
  0xfe   : > { %p1111_p7 = pnand %p1110_p6, %p1104_p1 }
 0x100   : > { %1114 = shalt.err (!%p1111_p7)
}
 0x101   : > { %1015 = dma.vmem_to_hbm [thread:$0]  (%p1251_p9), %s1425_s15, 128, %s1421_s14, %s820_s19  }
 0x102 PF: > { %p1021_p8 = scmp.ge.s32.totalorder %s1167_s30, 2  ;;  %s846_s12 = sand.u32 1, %s1147_s26  }
 0x103   : > { %s847_s18 = scalar_lea.sflag [#allocation6], %s846_s12 }
 0x104   : > { %p1018_p10 = pnand %p1021_p8, %p1258_p13 }
 0x106   : > { %1142 = dma.done.wait (!%p1018_p10), %s847_s18, 128  }
 0x107   : > { %1144 = vsyncadd (!%p1018_p10), %s847_s18, 4294967168  ;;  %s25_s30 = sadd.s32 1, %s1167_s30   ;;  %s1493_s21 = sld [smem:[#allocation9_spill]] }
 0x108   : > { %p22_p11 = scmp.ge.s32.totalorder %s25_s30, 4   ;;  %s1494_s0 = sld [smem:[#allocation12_spill]] }
 0x109   : > { %s1495_s28 = sld [smem:[#allocation10_spill]]  ;;  %s1496_s29 = sld [smem:[#allocation11_spill]] }
 0x10a   : > { %s1497_s26 = smov %s1151_s27  ;;  %24 = sbr.rel (!%p22_p11) target bundleno = 19 (0x13), region = 99 }
 0x10d   : > { %s1498_s27 = smov %s1493_s21 }
 0x111   :  { %852 = vsyncpa [#allocation6], 1 }
 0x112   :  { %854 = vsyncpa [#allocation6 + $0x1], 1 }

</bundles_post_ra>
